<compile_context>
chip_gen: v5e
topology: v5e:2x2
jax: 0.10.0
libtpu: 0.0.40
codegen_flags: <defaults>
</compile_context>

<pallas_src>
import math

import jax
import jax.numpy as jnp
from jax import lax
from jax.experimental import pallas as pl
from jax.experimental.pallas import tpu as pltpu


def _round_up(x, m):
    return ((x + m - 1) // m) * m


# ------------------------------- fused kernel -------------------------------

def _make_user_encoder_kernel(n_cat, total_vocab, n_layers, compute_dtype):
    """Fused UserEncoder forward kernel.

    Ref order: idx, numerical, W0_emb, W0_num, b0,
               (W_l, b_l) for l = 1..n_layers-1,
               bn_scale_last, bn_shift_last, out.
    """

    def kernel(*refs):
        idx_ref, num_ref = refs[0], refs[1]
        w0e_ref, w0n_ref, b0_ref = refs[2], refs[3], refs[4]
        mid_refs = refs[5:5 + 2 * (n_layers - 1)]
        s_ref = refs[5 + 2 * (n_layers - 1)]
        t_ref = refs[6 + 2 * (n_layers - 1)]
        out_ref = refs[-1]

        tb = num_ref.shape[0]
        idx = idx_ref[...]                                        # (tb, 8) int32

        # Combined one-hot over all categorical features.  Vocab offsets were
        # added in the wrapper; padded idx lanes carry -1 and never match.
        iota = lax.broadcasted_iota(jnp.int32, (tb, total_vocab), 1)
        hit = iota == idx[:, 0:1]
        for f in range(1, n_cat):
            hit = jnp.logical_or(hit, iota == idx[:, f:f + 1])
        one_hot = hit.astype(compute_dtype)                       # (tb, total_vocab)

        # ---- layer 0: embedding lookups pre-fused into W0_emb ---------------
        h = jnp.dot(one_hot, w0e_ref[...], preferred_element_type=jnp.float32)
        h = h + jnp.dot(num_ref[...].astype(compute_dtype), w0n_ref[...],
                        preferred_element_type=jnp.float32)
        x = jnp.maximum(h + b0_ref[...], 0.0)

        # ---- layers 1..n-1 (previous layer's eval-BN folded into W/b) -------
        for l in range(n_layers - 1):
            w_ref, b_ref = mid_refs[2 * l], mid_refs[2 * l + 1]
            x = jnp.dot(x.astype(compute_dtype), w_ref[...],
                        preferred_element_type=jnp.float32) + b_ref[...]
            x = jnp.maximum(x, 0.0)

        # ---- final (un-folded) eval-BN of the last layer ---------------------
        out_ref[...] = (x * s_ref[...] + t_ref[...]).astype(out_ref.dtype)

    return kernel


# ------------------------------ module wrapper -------------------------------

class UserEncoderPallas:
    def __init__(self, config, key, batch_tile=128, param_dtype=jnp.float32):
        self.config = config
        arch = config["model"]["architecture"]
        feat_cfg = config["data"]["features"]["user"]

        self.cat_features = list(feat_cfg["categorical_features"])
        self.cat_dims = [feat_cfg["categorical_dims"][f] for f in self.cat_features]
        self.emb_dim = feat_cfg["embedding_dim"]
        self.feature_dim = arch["user_feature_dim"]
        self.hidden_dims = list(arch["user_hidden_dims"])
        self.dropout = arch["dropout"]          # unused (eval mode)
        self.num_dim = self.feature_dim - len(self.cat_features) * self.emb_dim
        assert self.num_dim > 0
        self.batch_tile = batch_tile
        self.param_dtype = param_dtype          # bf16 on v6e/v7x for 2x MXU rate
        self.bn_eps = 1e-5

        n_cat = len(self.cat_features)
        n_layers = len(self.hidden_dims)
        keys = iter(jax.random.split(key, n_cat + 6 * n_layers))

        # Embedding tables (raw, kept for the reference path) + vocab padding.
        self.tables = []
        self.padded_vocabs = []
        padded_tables = []
        for vocab in self.cat_dims:
            pv = _round_up(vocab, 8)
            tbl = jax.random.normal(next(keys), (vocab, self.emb_dim), jnp.float32)
            self.tables.append(tbl)
            self.padded_vocabs.append(pv)
            padded_tables.append(jnp.pad(tbl, ((0, pv - vocab), (0, 0))))
        self.total_vocab = sum(self.padded_vocabs)
        self.vocab_offsets = []
        off = 0
        for pv in self.padded_vocabs:
            self.vocab_offsets.append(off)
            off += pv

        # Raw MLP parameters (pre-transposed to (in, out)) + eval-BN statistics.
        self.raw_layers = []
        self.bn_raw = []
        prev = self.feature_dim
        for dim in self.hidden_dims:
            bound = 1.0 / math.sqrt(prev)
            w = jax.random.uniform(next(keys), (prev, dim), jnp.float32, -bound, bound)
            b = jax.random.uniform(next(keys), (1, dim), jnp.float32, -bound, bound)
            gamma = jax.random.uniform(next(keys), (1, dim), jnp.float32, 0.8, 1.2)
            beta = 0.1 * jax.random.normal(next(keys), (1, dim), jnp.float32)
            mean = 0.1 * jax.random.normal(next(keys), (1, dim), jnp.float32)
            var = jax.random.uniform(next(keys), (1, dim), jnp.float32, 0.5, 1.5)
            self.raw_layers.append((w, b))
            self.bn_raw.append((gamma, beta, mean, var))
            prev = dim

        # ---- init-time fusion (review items 1, 4, 5) -------------------------
        # Per-layer eval-BN -> affine (scale, shift).
        scales, shifts = [], []
        for (gamma, beta, mean, var) in self.bn_raw:
            s = gamma / jnp.sqrt(var + self.bn_eps)
            scales.append(s)
            shifts.append(beta - mean * s)

        # Fold every hidden layer's BN into the NEXT Linear; only the last
        # layer keeps (scale, shift) in-kernel.
        folded = [(w, b) for (w, b) in self.raw_layers]
        for l in range(n_layers - 1):
            w_next, b_next = folded[l + 1]
            b_next = b_next + shifts[l] @ w_next        # t @ W (original W)
            w_next = w_next * scales[l].reshape(-1, 1)  # diag(s) @ W
            folded[l + 1] = (w_next, b_next)

        # Fuse the embedding tables into the first Linear.
        w0, b0 = folded[0]
        w0_emb_parts = []
        for f in range(n_cat):
            rows = w0[f * self.emb_dim:(f + 1) * self.emb_dim, :]
            w0_emb_parts.append(padded_tables[f] @ rows)
        w0_emb = jnp.concatenate(w0_emb_parts, axis=0)        # (total_vocab, h0)
        w0_num = w0[n_cat * self.emb_dim:, :]                 # (num_dim, h0)

        # Lane-dense output: pad the last layer's columns to a multiple of 128.
        out_dim = self.hidden_dims[-1]
        self.out_pad = _round_up(out_dim, 128)
        pad = self.out_pad - out_dim
        scale_last = jnp.pad(scales[-1], ((0, 0), (0, pad)))
        shift_last = jnp.pad(shifts[-1], ((0, 0), (0, pad)))
        if n_layers == 1:
            w0_emb = jnp.pad(w0_emb, ((0, 0), (0, pad)))
            w0_num = jnp.pad(w0_num, ((0, 0), (0, pad)))
            b0 = jnp.pad(b0, ((0, 0), (0, pad)))
            mid = []
        else:
            mid = [list(p) for p in folded[1:]]
            w_last, b_last = mid[-1]
            mid[-1] = [jnp.pad(w_last, ((0, 0), (0, pad))),
                       jnp.pad(b_last, ((0, 0), (0, pad)))]

        pd = self.param_dtype
        self.w0_emb = w0_emb.astype(pd)
        self.w0_num = w0_num.astype(pd)
        self.b0 = b0                                           # f32 (elementwise path)
        self.mid_layers = [(w.astype(pd), b) for (w, b) in mid]
        self.bn_scale_last = scale_last
        self.bn_shift_last = shift_last

    def __call__(self, features):
        n_cat = len(self.cat_features)
        idx = jnp.stack(
            [features[f"{f}_encoded"] for f in self.cat_features], axis=1
        ).astype(jnp.int32)                                     # (B, n_cat)
        idx = idx + jnp.asarray(self.vocab_offsets, jnp.int32)[None, :]
        numerical = features["numerical"].astype(jnp.float32)   # (B, num_dim)
        B = idx.shape[0]
        out_dim = self.hidden_dims[-1]

        # Batch tiling: pad B to a multiple of the tile; -1 idx sentinels in
        # padded rows/lanes never match the in-kernel iota.
        tb = min(self.batch_tile, _round_up(B, 8))
        b_pad = _round_up(B, tb)
        idx_p = jnp.full((b_pad, 8), -1, jnp.int32).at[:B, :n_cat].set(idx)
        num_p = jnp.zeros((b_pad, self.num_dim), jnp.float32).at[:B].set(numerical)

        kernel = _make_user_encoder_kernel(
            n_cat, self.total_vocab, len(self.hidden_dims), self.param_dtype)

        args = [idx_p, num_p, self.w0_emb, self.w0_num, self.b0]
        for (w, b) in self.mid_layers:
            args += [w, b]
        args += [self.bn_scale_last, self.bn_shift_last]

        in_specs = [
            pl.BlockSpec((tb, 8), lambda i: (i, 0)),
            pl.BlockSpec((tb, self.num_dim), lambda i: (i, 0)),
        ]
        for a in args[2:]:
            in_specs.append(pl.BlockSpec(a.shape, lambda i: (0, 0)))

        out = pl.pallas_call(
            kernel,
            out_shape=jax.ShapeDtypeStruct((b_pad, self.out_pad), jnp.float32),
            grid=(b_pad // tb,),
            in_specs=in_specs,
            out_specs=pl.BlockSpec((tb, self.out_pad), lambda i: (i, 0)),
            compiler_params=pltpu.CompilerParams(
                dimension_semantics=("parallel",),
                vmem_limit_bytes=32 * 1024 * 1024),
        )(*args)
        return out[:B, :out_dim]


# --------------------------------- reference ---------------------------------

def _reference(enc, features):
    embs = []
    for i, feat in enumerate(enc.cat_features):
        embs.append(enc.tables[i][features[f"{feat}_encoded"]])
    x = jnp.concatenate(
        embs + [features["numerical"].astype(jnp.float32)], axis=1)
    for l in range(len(enc.hidden_dims)):
        w, b = enc.raw_layers[l]
        gamma, beta, mean, var = enc.bn_raw[l]
        x = jnp.maximum(x @ w + b, 0.0)
        x = (x - mean) / jnp.sqrt(var + enc.bn_eps) * gamma + beta
        # dropout: eval-mode no-op
    return x


# ------------------------------------ main ------------------------------------

if __name__ == "__main__":
    config = {
        "model": {
            "architecture": {
                "user_feature_dim": 32,        # 3 * 8 (embeddings) + 8 (numerical)
                "user_hidden_dims": [64, 32],
                "dropout": 0.1,
            }
        },
        "data": {
            "features": {
                "user": {
                    "embedding_dim": 8,
                    "categorical_features": ["gender", "age_group", "occupation"],
                    "categorical_dims": {"gender": 3, "age_group": 7, "occupation": 21},
                }
            }
        },
    }
    B = 256   # 2 tiles of 128 -> both TensorCores busy on v7x

    root = jax.random.PRNGKey(0)
    k_params, k_g, k_a, k_o, k_num = jax.random.split(root, 5)
    cat_dims = config["data"]["features"]["user"]["categorical_dims"]
    features = {
        "gender_encoded": jax.random.randint(k_g, (B,), 0, cat_dims["gender"]),
        "age_group_encoded": jax.random.randint(k_a, (B,), 0, cat_dims["age_group"]),
        "occupation_encoded": jax.random.randint(k_o, (B,), 0, cat_dims["occupation"]),
        "numerical": jax.random.normal(k_num, (B, 8), jnp.float32),
    }

    enc = UserEncoderPallas(config, k_params, batch_tile=128)
    out = enc(features)
    jax.block_until_ready(out)

    ref = _reference(enc, features)
    assert out.shape == (B, config["model"]["architecture"]["user_hidden_dims"][-1])
    err = float(jnp.max(jnp.abs(out - ref)))
    assert jnp.allclose(out, ref, atol=2e-4, rtol=2e-4), err

    print("KERNEL_OK")
</pallas_src>

<mosaic_0001>
module attributes {stable_mosaic.version = 11 : i64} {
  func.func @kernel(%arg0: i32, %arg1: memref<128x8xi32, #tpu.memory_space<vmem>>, %arg2: memref<128x8xf32, #tpu.memory_space<vmem>>, %arg3: memref<40x64xf32, #tpu.memory_space<vmem>>, %arg4: memref<8x64xf32, #tpu.memory_space<vmem>>, %arg5: memref<1x64xf32, #tpu.memory_space<vmem>>, %arg6: memref<64x128xf32, #tpu.memory_space<vmem>>, %arg7: memref<1x128xf32, #tpu.memory_space<vmem>>, %arg8: memref<1x128xf32, #tpu.memory_space<vmem>>, %arg9: memref<1x128xf32, #tpu.memory_space<vmem>>, %arg10: memref<128x128xf32, #tpu.memory_space<vmem>>) attributes {dimension_semantics = [#tpu.dimension_semantics<parallel>], iteration_bounds = array<i64: 2>, scalar_prefetch = 0 : i64, scratch_operands = 0 : i64, tpu.core_type = #tpu.core_type<tc>, window_params = [{transform_indices = @transform_0, window_bounds = array<i64: 128, 8>}, {transform_indices = @transform_1, window_bounds = array<i64: 128, 8>}, {pipeline_mode = #tpu.pipeline_mode<synchronous>, transform_indices = @transform_2, window_bounds = array<i64: 40, 64>}, {pipeline_mode = #tpu.pipeline_mode<synchronous>, transform_indices = @transform_3, window_bounds = array<i64: 8, 64>}, {pipeline_mode = #tpu.pipeline_mode<synchronous>, transform_indices = @transform_4, window_bounds = array<i64: 1, 64>}, {pipeline_mode = #tpu.pipeline_mode<synchronous>, transform_indices = @transform_5, window_bounds = array<i64: 64, 128>}, {pipeline_mode = #tpu.pipeline_mode<synchronous>, transform_indices = @transform_6, window_bounds = array<i64: 1, 128>}, {pipeline_mode = #tpu.pipeline_mode<synchronous>, transform_indices = @transform_7, window_bounds = array<i64: 1, 128>}, {pipeline_mode = #tpu.pipeline_mode<synchronous>, transform_indices = @transform_8, window_bounds = array<i64: 1, 128>}, {transform_indices = @transform_9, window_bounds = array<i64: 128, 128>}]} {
    %c0 = arith.constant 0 : index
    %c0_0 = arith.constant 0 : index
    %0 = vector.load %arg1[%c0, %c0_0] : memref<128x8xi32, #tpu.memory_space<vmem>>, vector<128x8xi32>
    %1 = tpu.iota {dimensions = array<i32: 1>} : vector<128x40xi32>
    %2 = vector.extract_strided_slice %0 {offsets = [0, 0], sizes = [128, 1], strides = [1, 1]} : vector<128x8xi32> to vector<128x1xi32>
    %3 = vector.broadcast %2 : vector<128x1xi32> to vector<128x40xi32>
    %4 = arith.cmpi eq, %1, %3 : vector<128x40xi32>
    %5 = vector.extract_strided_slice %0 {offsets = [0, 1], sizes = [128, 1], strides = [1, 1]} : vector<128x8xi32> to vector<128x1xi32>
    %6 = vector.broadcast %5 : vector<128x1xi32> to vector<128x40xi32>
    %7 = arith.cmpi eq, %1, %6 : vector<128x40xi32>
    %8 = arith.ori %4, %7 : vector<128x40xi1>
    %9 = vector.extract_strided_slice %0 {offsets = [0, 2], sizes = [128, 1], strides = [1, 1]} : vector<128x8xi32> to vector<128x1xi32>
    %10 = vector.broadcast %9 : vector<128x1xi32> to vector<128x40xi32>
    %11 = arith.cmpi eq, %1, %10 : vector<128x40xi32>
    %12 = arith.ori %8, %11 : vector<128x40xi1>
    %13 = arith.extui %12 : vector<128x40xi1> to vector<128x40xi32>
    %14 = arith.sitofp %13 : vector<128x40xi32> to vector<128x40xf32>
    %c0_1 = arith.constant 0 : index
    %c0_2 = arith.constant 0 : index
    %15 = vector.load %arg3[%c0_1, %c0_2] : memref<40x64xf32, #tpu.memory_space<vmem>>, vector<40x64xf32>
    %cst = arith.constant dense<0.000000e+00> : vector<128x64xf32>
    %16 = tpu.matmul %14, %15, %cst {dimension_numbers = #tpu.dot_dimension_numbers<[1], [0], [0], [1], [0, 0, 1, 1], [], []>} : vector<128x40xf32>, vector<40x64xf32>, vector<128x64xf32> -> vector<128x64xf32>
    %c0_3 = arith.constant 0 : index
    %c0_4 = arith.constant 0 : index
    %17 = vector.load %arg2[%c0_3, %c0_4] : memref<128x8xf32, #tpu.memory_space<vmem>>, vector<128x8xf32>
    %c0_5 = arith.constant 0 : index
    %c0_6 = arith.constant 0 : index
    %18 = vector.load %arg4[%c0_5, %c0_6] : memref<8x64xf32, #tpu.memory_space<vmem>>, vector<8x64xf32>
    %cst_7 = arith.constant dense<0.000000e+00> : vector<128x64xf32>
    %19 = tpu.matmul %17, %18, %cst_7 {dimension_numbers = #tpu.dot_dimension_numbers<[1], [0], [0], [1], [0, 0, 1, 1], [], []>} : vector<128x8xf32>, vector<8x64xf32>, vector<128x64xf32> -> vector<128x64xf32>
    %20 = arith.addf %16, %19 : vector<128x64xf32>
    %c0_8 = arith.constant 0 : index
    %c0_9 = arith.constant 0 : index
    %21 = vector.load %arg5[%c0_8, %c0_9] : memref<1x64xf32, #tpu.memory_space<vmem>>, vector<1x64xf32>
    %22 = vector.broadcast %21 : vector<1x64xf32> to vector<128x64xf32>
    %23 = arith.addf %20, %22 : vector<128x64xf32>
    %cst_10 = arith.constant 0.000000e+00 : f32
    %24 = vector.broadcast %cst_10 : f32 to vector<128x64xf32>
    %25 = arith.maximumf %23, %24 : vector<128x64xf32>
    %c0_11 = arith.constant 0 : index
    %c0_12 = arith.constant 0 : index
    %26 = vector.load %arg6[%c0_11, %c0_12] : memref<64x128xf32, #tpu.memory_space<vmem>>, vector<64x128xf32>
    %cst_13 = arith.constant dense<0.000000e+00> : vector<128x128xf32>
    %27 = tpu.matmul %25, %26, %cst_13 {dimension_numbers = #tpu.dot_dimension_numbers<[1], [0], [0], [1], [0, 0, 1, 1], [], []>} : vector<128x64xf32>, vector<64x128xf32>, vector<128x128xf32> -> vector<128x128xf32>
    %c0_14 = arith.constant 0 : index
    %c0_15 = arith.constant 0 : index
    %28 = vector.load %arg7[%c0_14, %c0_15] : memref<1x128xf32, #tpu.memory_space<vmem>>, vector<1x128xf32>
    %29 = vector.broadcast %28 : vector<1x128xf32> to vector<128x128xf32>
    %30 = arith.addf %27, %29 : vector<128x128xf32>
    %cst_16 = arith.constant 0.000000e+00 : f32
    %31 = vector.broadcast %cst_16 : f32 to vector<128x128xf32>
    %32 = arith.maximumf %30, %31 : vector<128x128xf32>
    %c0_17 = arith.constant 0 : index
    %c0_18 = arith.constant 0 : index
    %33 = vector.load %arg8[%c0_17, %c0_18] : memref<1x128xf32, #tpu.memory_space<vmem>>, vector<1x128xf32>
    %34 = vector.broadcast %33 : vector<1x128xf32> to vector<128x128xf32>
    %35 = arith.mulf %32, %34 : vector<128x128xf32>
    %c0_19 = arith.constant 0 : index
    %c0_20 = arith.constant 0 : index
    %36 = vector.load %arg9[%c0_19, %c0_20] : memref<1x128xf32, #tpu.memory_space<vmem>>, vector<1x128xf32>
    %37 = vector.broadcast %36 : vector<1x128xf32> to vector<128x128xf32>
    %38 = arith.addf %35, %37 : vector<128x128xf32>
    %c0_21 = arith.constant 0 : index
    %c0_22 = arith.constant 0 : index
    %39 = vector.load %arg10[%c0_21, %c0_22] : memref<128x128xf32, #tpu.memory_space<vmem>>, vector<128x128xf32>
    tpu.vector_store %arg10[%c0_21, %c0_22], %38 {strides = array<i32>} : memref<128x128xf32, #tpu.memory_space<vmem>>, vector<128x128xf32>,
    return
  }
  func.func @transform_0(%arg0: i32) -> (i32, i32) {
    %c0_i32 = arith.constant 0 : i32
    %c0_i32_0 = arith.constant 0 : i32
    return %arg0, %c0_i32 : i32, i32
  }
  func.func @transform_1(%arg0: i32) -> (i32, i32) {
    %c0_i32 = arith.constant 0 : i32
    %c0_i32_0 = arith.constant 0 : i32
    return %arg0, %c0_i32 : i32, i32
  }
  func.func @transform_2(%arg0: i32) -> (i32, i32) {
    %c0_i32 = arith.constant 0 : i32
    %c0_i32_0 = arith.constant 0 : i32
    %c0_i32_1 = arith.constant 0 : i32
    return %c0_i32, %c0_i32_0 : i32, i32
  }
  func.func @transform_3(%arg0: i32) -> (i32, i32) {
    %c0_i32 = arith.constant 0 : i32
    %c0_i32_0 = arith.constant 0 : i32
    %c0_i32_1 = arith.constant 0 : i32
    return %c0_i32, %c0_i32_0 : i32, i32
  }
  func.func @transform_4(%arg0: i32) -> (i32, i32) {
    %c0_i32 = arith.constant 0 : i32
    %c0_i32_0 = arith.constant 0 : i32
    %c0_i32_1 = arith.constant 0 : i32
    return %c0_i32, %c0_i32_0 : i32, i32
  }
  func.func @transform_5(%arg0: i32) -> (i32, i32) {
    %c0_i32 = arith.constant 0 : i32
    %c0_i32_0 = arith.constant 0 : i32
    %c0_i32_1 = arith.constant 0 : i32
    return %c0_i32, %c0_i32_0 : i32, i32
  }
  func.func @transform_6(%arg0: i32) -> (i32, i32) {
    %c0_i32 = arith.constant 0 : i32
    %c0_i32_0 = arith.constant 0 : i32
    %c0_i32_1 = arith.constant 0 : i32
    return %c0_i32, %c0_i32_0 : i32, i32
  }
  func.func @transform_7(%arg0: i32) -> (i32, i32) {
    %c0_i32 = arith.constant 0 : i32
    %c0_i32_0 = arith.constant 0 : i32
    %c0_i32_1 = arith.constant 0 : i32
    return %c0_i32, %c0_i32_0 : i32, i32
  }
  func.func @transform_8(%arg0: i32) -> (i32, i32) {
    %c0_i32 = arith.constant 0 : i32
    %c0_i32_0 = arith.constant 0 : i32
    %c0_i32_1 = arith.constant 0 : i32
    return %c0_i32, %c0_i32_0 : i32, i32
  }
  func.func @transform_9(%arg0: i32) -> (i32, i32) {
    %c0_i32 = arith.constant 0 : i32
    %c0_i32_0 = arith.constant 0 : i32
    return %arg0, %c0_i32 : i32, i32
  }
}

</mosaic_0001>

<bundles_post_ra>
// kernel: tpu_custom_call.1
= control target key start
LH: loop header
LB: loop body
LE: loop exit
PB: predicated region body
PF: predicated region fallthrough
CT: control target
= control target key end

     0   :  { %14 = vsyncpa [#allocation3], 0  ;;  %s1926_s0 = inlined_call_operand.vmem [shape: s32[256,8], index: 0, kind: input, shape index: {}]   ;;  %s1927_s1 = inlined_call_operand.vmem [shape: f32[256,8], index: 1, kind: input, shape index: {}]   ;;  %s1928_s2 = inlined_call_operand.vmem [shape: f32[40,64], index: 2, kind: input, shape index: {}]   ;;  %s1929_s3 = inlined_call_operand.vmem [shape: f32[8,64], index: 3, kind: input, shape index: {}]   ;;  %s1930_s4 = inlined_call_operand.vmem [shape: f32[1,64], index: 4, kind: input, shape index: {}]   ;;  %s1931_s5 = inlined_call_operand.vmem [shape: f32[64,128], index: 5, kind: input, shape index: {}]   ;;  %s1932_s6 = inlined_call_operand.vmem [shape: f32[1,128], index: 6, kind: input, shape index: {}]   ;;  %s1933_s7 = inlined_call_operand.vmem [shape: f32[1,128], index: 7, kind: input, shape index: {}]   ;;  %s1934_s8 = inlined_call_operand.vmem [shape: f32[1,128], index: 8, kind: input, shape index: {}]   ;;  %s1935_s9 = inlined_call_operand.hbm [shape: f32[256,128], index: 9, kind: output, shape index: {}]  }
   0x1   :  { %16 = vsyncpa [#allocation3 + $0x1], 0  ;;  %s1498_s30 = smov 0   ;;  %s1500_s10 = smov 0  }
   0x2   :  { %s1502_s11 = smov 0   ;;  %s1504_s12 = smov 0  }
   0x3 LB: > { %s1519_s13 = sadd.s32 4294967295, %s1440_s12   ;;  %s1204_s14 = sadd.s32 4294967294, %s1440_s12   ;;  %s1440_s12 = sphi %s1504_s12, %s1941_s12   ;;  %s1436_s11 = sphi %s1502_s11, %s1940_s11   ;;  %s1432_s10 = sphi %s1500_s10, %s1939_s10   ;;  %s1428_s30 = sphi %s1498_s30, %s1938_s30  }
   0x4   : > { %s1523_s15 = sadd.s32 1, %s1440_s12   ;;  %s228_s16 = sadd.s32 1, %s1436_s11 }
   0x5   : > { %s225_s17 = ssub.s32 %s1440_s12, %s1523_s15  ;;  %p238_p0 = scmp.ne.s32.totalorder %s1436_s11, %s1432_s10 }
   0x6   : > { %p226_p1 = scmp.eq.s32.totalorder %s225_s17, 0  ;;  %p239_p2 = scmp.eq.s32.totalorder %s1519_s13, 1 }
   0x7   : > { %p244_p3 = scmp.ne.s32.totalorder %s1432_s10, %s1428_s30  ;;  %p245_p4 = scmp.eq.s32.totalorder %s1204_s14, 1 }
   0x8   : > { %s1534_s18 = scalar_select %p226_p1, %s1436_s11, %s228_s16  }
   0x9   : > { %p1536_p5 = por %p239_p2, %p238_p0  ;;  %p1540_p6 = por %p245_p4, %p244_p3 }
   0xa   : > { %p1207_p7 = scmp.ge.s32.totalorder %s1440_s12, 1  ;;  %p302_p8 = scmp.lt.s32.totalorder %s1440_s12, 3 }
   0xc   : > { %p303_p9 = pnand %p1207_p7, %p302_p8 }
   0xd   : > { %s1209_s21 = sshll.u32 (!%p303_p9), %s1519_s13, 4  ;;  %s340_s28 = sand.u32 (!%p303_p9), 1, %s1432_s10  }
   0xe   : > { %306 = sbr.rel (%p303_p9) target bundleno = 577 (0x241), region = 56  ;;  %p344_p10 = scmp.lt.s32.totalorder (!%p303_p9), %s1209_s21, 31 }
   0xf   : > { %s1208_s16 = sshll.u32 (!%p303_p9), %s340_s28, 7  ;;  %s1282_s17 = sshll.u32 (!%p303_p9), %s1519_s13, 7 }
  0x10   : > { %s1126_s26 = scalar_lea.hbm (!%p303_p9), %s1935_s9, %s1282_s17  ;;  %s1115_s13 = scalar_lea.sflag (!%p303_p9), [#allocation3], %s340_s28 }
  0x11   : > { %s1129_s29 = sshll.u32 (!%p303_p9), %s1126_s26, 4  ;;  %s1398_s17 = scalar_lea.hbm (!%p303_p9), %s1935_s9, 256  ;;  %s1130_s29 = int_to_ptr.hbm [resolvable:$true] %s1129_s29 }
  0x12   : > { %s1392_s14 = sshra.s32 (!%p303_p9), %s1130_s29, 4  ;;  %s1393_s14 = int_to_ptr.hbm [resolvable:$true] %s1392_s14 }
  0x13   : > { %v1442_v0 = vmov 2   ;;  %v1443_v1 = vmov 0   ;;  %v1444_v2 = vmov 1   ;;  %s1943_s21 = smov (!%p344_p10, %s1209_s21), 31  ;;  %v634_v14 = vld [vmem:[%s1928_s2 + $0x20] sm:$0xff]  ;;  %v633_v16 = vld [vmem:[%s1928_s2 + $0x18] sm:$0xff]  ;;  %v372_v31 = vlaneseq  ;;  %p1399_p0 = scmp.lt.s32.totalorder %s1393_s14, %s1935_s9 }
  0x14   : > { %1344 = vset.pattern.permute.xlu1 %v1442_v0  ;;  %1342 = vset.pattern.permute.xlu0 %v1443_v1  ;;  %s1210_s22 = sshll.u32 %s1943_s21, 3  ;;  %v632_v17 = vld [vmem:[%s1928_s2 + $0x10] sm:$0xff]  ;;  %v631_v19 = vld [vmem:[%s1928_s2 + $0x8] sm:$0xff]  ;;  %v651_v21 = vld [vmem:[%s1929_s3] sm:$0xff]  ;;  %vm652_vm0 = vcmask 64512   ;;  %vm766_vm5 = vcmask 326656  }
  0x15   : > { %1346 = vset.pattern.permute.xlu2 %v1444_v2  ;;  %s1558_s25 = scalar_lea.vmem %s1926_s0, %s1210_s22  ;;  %826 = vmatpush.msra.mxu1 %v634_v14  ;;  %s1610_s27 = scalar_lea.vmem %s1927_s1, %s1210_s22  ;;  %v630_v22 = vld [vmem:[%s1928_s2] sm:$0xff]  ;;  %v1633_v34 = vand.u32 127, %v372_v31  ;;  %v1445_v40 = vmov 0.0  }
  0x16   : > { %v356_v3 = vld [vmem:[%s1558_s25] sm:$0xff]  ;;  %v357_v4 = vld [vmem:[%s1558_s25 + $0x8] sm:$0xff]  ;;  %v358_v5 = vld [vmem:[%s1558_s25 + $0x10] sm:$0xff]  ;;  %716 = vmatpush.msra.mxu0 %v651_v21  ;;  %1283 = vmatpush.msra.mxu3 %v651_v21 }
  0x17   : > { %519 = vperm.xlu1 %1344, %v356_v3   ;;  %375 = vperm.xlu0 %1342, %v356_v3   ;;  %v359_v6 = vld [vmem:[%s1558_s25 + $0x18] sm:$0xff]  ;;  %v360_v7 = vld [vmem:[%s1558_s25 + $0x20] sm:$0xff]  ;;  %v362_v8 = vld [vmem:[%s1558_s25 + $0x30] sm:$0xff] }
  0x18   : > { %442 = vperm.xlu2 %1346, %v357_v4   ;;  %v363_v9 = vld [vmem:[%s1558_s25 + $0x38] sm:$0xff]  ;;  %v361_v10 = vld [vmem:[%s1558_s25 + $0x28] sm:$0xff]  ;;  %v364_v13 = vld [vmem:[%s1558_s25 + $0x40] sm:$0xff]  ;;  %827 = vmatpush.msra.mxu1 %v633_v16 }
  0x19   : > { %v365_v11 = vld [vmem:[%s1558_s25 + $0x48] sm:$0xff]  ;;  %v367_v12 = vld [vmem:[%s1558_s25 + $0x58] sm:$0xff]  ;;  %v368_v15 = vld [vmem:[%s1558_s25 + $0x60] sm:$0xff]  ;;  %1284 = vmatpush.msrb.mxu3 %v634_v14 }
  0x1a   : > { %828 = vmatpush.msra.mxu1 %v632_v17  ;;  %v366_v20 = vld [vmem:[%s1558_s25 + $0x50] sm:$0xff]  ;;  %v635_v23 = vld [vmem:[%s1610_s27] sm:$0xff]  ;;  %v636_v25 = vld [vmem:[%s1610_s27 + $0x8] sm:$0xff] }
  0x1b   : > { %1229 = vmatmul.msk.f32.vlgmr.msra.gmra.mxu0 %vm652_vm0, %v635_v23  ;;  %1285 = vmatpush.msrb.mxu3 %v633_v16  ;;  %v370_v26 = vld [vmem:[%s1558_s25 + $0x70] sm:$0xff]  ;;  %v638_v33 = vld [vmem:[%s1610_s27 + $0x18] sm:$0xff]  ;;  %v369_v37 = vld [vmem:[%s1558_s25 + $0x68] sm:$0xff] }
  0x1c   : > { %829 = vmatpush.msra.mxu1 %v631_v19  ;;  %v637_v28 = vld [vmem:[%s1610_s27 + $0x10] sm:$0xff]  ;;  %v639_v39 = vld [vmem:[%s1610_s27 + $0x20] sm:$0xff]  ;;  %v640_v45 = vld [vmem:[%s1610_s27 + $0x28] sm:$0xff] }
  0x1d   : > { %1286 = vmatpush.msrb.mxu3 %v632_v17  ;;  %v641_v48 = vld [vmem:[%s1610_s27 + $0x30] sm:$0xff]  ;;  %v371_v50 = vld [vmem:[%s1558_s25 + $0x78] sm:$0xff]  ;;  %v643_v63 = vld [vmem:[%s1610_s27 + $0x40] sm:$0xff]  ;;  %s1827_s25 = scalar_lea.vmem [#allocation2], %s1208_s16  ;;  %s1394_s16 = scalar_lea.hbm %s1393_s14, 128 }
  0x1e   : > { %830 = vmatpush.msra.mxu1 %v630_v22  ;;  %v642_v55 = vld [vmem:[%s1610_s27 + $0x38] sm:$0xff]  ;;  %v647_v21 = vld [vmem:[%s1610_s27 + $0x60] sm:$0xff]  ;;  %v922_v23 = vld [vmem:[%s1931_s5 + $0x30] sm:$0xff]  ;;  %p1395_p11 = scmp.ne.s32.totalorder %s1393_s14, %s1394_s16  ;;  %p1400_p1 = scmp.lt.s32.totalorder %s1398_s17, %s1394_s16 }
  0x1f   : > { %1345 = vset.pattern.permute.xlu1 %v1443_v1  ;;  %1343 = vset.pattern.permute.xlu0 %v1444_v2  ;;  %v650_v14 = vld [vmem:[%s1610_s27 + $0x78] sm:$0xff] }
  0x20   : > { %378 = vperm.xlu1 %1345, %v357_v4   ;;  %439 = vperm.xlu0 %1343, %v356_v3   ;;  %v644_v3 = vld [vmem:[%s1610_s27 + $0x48] sm:$0xff]  ;;  %p1396_p12 = pnand %p1395_p11, %p1536_p5  ;;  %p1401_p2 = por %p1400_p1, %p1399_p0 }
  0x21   : > { %1347 = vset.pattern.permute.xlu2 %v1442_v0  ;;  %1287 = vmatpush.msrb.mxu3 %v631_v19 }
  0x22   : > { %522 = vperm.xlu2 %1347, %v357_v4   ;;  %p1397_p13 = pneg %p1396_p12 }
  0x23   : > { %1230 = vmatmul.msk.f32.gmra.mxu0 %vm652_vm0, %v636_v25  ;;  %1288 = vmatpush.msrb.mxu3 %v630_v22  ;;  %v923_v22 = vld [vmem:[%s1931_s5 + $0x38] sm:$0xff] }
  0x24   : > { %985 = vmatpush.msra.mxu2 %v923_v22  ;;  %p1402_p3 = pnand %p1401_p2, %p1397_p13 }
  0x26   : > { %986 = vmatpush.msra.mxu2 %v922_v23 }
  0x28   : > { %381 = vperm.xlu1 %1345, %v358_v5   ;;  %1349 = vset.pattern.permute.xlu0 %v1442_v0 }
  0x29   : > { %525 = vperm.xlu0 %1349, %v358_v5  }
  0x2a   : > { %1348 = vset.pattern.permute.xlu2 %v1444_v2 }
  0x2b   : > { %445 = vperm.xlu2 %1348, %v358_v5   ;;  %1231 = vmatmul.msk.f32.gmra.mxu0 %vm652_vm0, %v637_v28  ;;  %v648_v5 = vld [vmem:[%s1610_s27 + $0x68] sm:$0xff] }
  0x2c   : > { %1242 = vmatmul.msk.f32.vlgmr.msra.gmra.mxu3 %vm652_vm0, %v648_v5 }
  0x2d   : > { %1289 = vmatpush.msra.mxu3 %v923_v22 }
  0x2f   : > { %1290 = vmatpush.msra.mxu3 %v922_v23 }
  0x30   : > { %384 = vperm.xlu1 %1345, %v359_v6  }
  0x31   : > { %1352 = vset.pattern.permute.xlu0 %v1444_v2 }
  0x32   : > { %451 = vperm.xlu0 %1352, %v360_v7  }
  0x33   : > { %448 = vperm.xlu2 %1348, %v359_v6   ;;  %1232 = vmatmul.msk.f32.gmra.mxu0 %vm652_vm0, %v638_v33 }
  0x38   : > { %1350 = vset.pattern.permute.xlu1 %v1442_v0 }
  0x39   : > { %528 = vperm.xlu1 %1350, %v359_v6  }
  0x3a   : > { %1355 = vset.pattern.permute.xlu0 %v1443_v1 }
  0x3b   : > { %1351 = vset.pattern.permute.xlu2 %v1443_v1  ;;  %393 = vperm.xlu0 %1355, %v362_v8  }
  0x3c   : > { %387 = vperm.xlu2 %1351, %v360_v7   ;;  %1233 = vmatmul.msk.f32.gmra.mxu0 %vm652_vm0, %v639_v39 }
  0x41   : > { %531 = vperm.xlu1 %1350, %v360_v7  }
  0x43   : > { %1358 = vset.pattern.permute.xlu0 %v1442_v0 }
  0x44   : > { %390 = vperm.xlu2 %1351, %v361_v10   ;;  %540 = vperm.xlu0 %1358, %v363_v9  }
  0x45   : > { %1234 = vmatmul.msk.f32.gmra.mxu0 %vm652_vm0, %v640_v45 }
  0x49   : > { %1353 = vset.pattern.permute.xlu1 %v1444_v2 }
  0x4a   : > { %454 = vperm.xlu1 %1353, %v361_v10  }
  0x4c   : > { %1354 = vset.pattern.permute.xlu2 %v1442_v0  ;;  %1361 = vset.pattern.permute.xlu0 %v1444_v2 }
  0x4d   : > { %534 = vperm.xlu2 %1354, %v361_v10   ;;  %466 = vperm.xlu0 %1361, %v365_v11   ;;  %v649_v10 = vld [vmem:[%s1610_s27 + $0x70] sm:$0xff] }
  0x4e   : > { %1235 = vmatmul.msk.f32.gmra.mxu0 %vm652_vm0, %v641_v48  ;;  %1243 = vmatmul.msk.f32.gmra.mxu3 %vm652_vm0, %v649_v10 }
  0x52   : > { %457 = vperm.xlu1 %1353, %v362_v8  }
  0x55   : > { %537 = vperm.xlu2 %1354, %v362_v8   ;;  %1364 = vset.pattern.permute.xlu0 %v1443_v1 }
  0x56   : > { %408 = vperm.xlu0 %1364, %v367_v12   ;;  %1236 = vmatmul.msk.f32.gmra.mxu0 %vm652_vm0, %v642_v55 }
  0x57   : > { %1244 = vmatmul.msk.f32.gmra.mxu3 %vm652_vm0, %v650_v14 }
  0x5a   : > { %1356 = vset.pattern.permute.xlu1 %v1443_v1 }
  0x5b   : > { %396 = vperm.xlu1 %1356, %v363_v9  }
  0x5d   : > { %1357 = vset.pattern.permute.xlu2 %v1444_v2 }
  0x5e   : > { %460 = vperm.xlu2 %1357, %v363_v9   ;;  %1367 = vset.pattern.permute.xlu0 %v1442_v0  ;;  %v645_v9 = vld [vmem:[%s1610_s27 + $0x50] sm:$0xff] }
  0x5f   : > { %555 = vperm.xlu0 %1367, %v368_v15   ;;  %1237 = vmatmul.msk.f32.gmra.mxu0 %vm652_vm0, %v643_v63 }
  0x63   : > { %399 = vperm.xlu1 %1356, %v364_v13  }
  0x66   : > { %463 = vperm.xlu2 %1357, %v364_v13  }
  0x67   : > { %1370 = vset.pattern.permute.xlu0 %v1444_v2  ;;  %1238 = vmatmul.msk.f32.gmra.mxu0 %vm652_vm0, %v644_v3 }
  0x68   : > { %481 = vperm.xlu0 %1370, %v370_v26  }
  0x6b   : > { %1359 = vset.pattern.permute.xlu1 %v1442_v0 }
  0x6c   : > { %543 = vperm.xlu1 %1359, %v364_v13  }
  0x6e   : > { %1360 = vset.pattern.permute.xlu2 %v1443_v1 }
  0x6f   : > { %402 = vperm.xlu2 %1360, %v365_v11   ;;  %1239 = vmatmul.msk.f32.gmra.mxu0 %vm652_vm0, %v645_v9 }
  0x70   : > { %1373 = vset.pattern.permute.xlu0 %v1442_v0 }
  0x72   : > { %v1600_v18 = vpop.permute.xlu2 %442 }
  0x73   : > { %vm487_vm8 = vcmp.eq.s32.totalorder %v1633_v34, %v1600_v18 }
  0x74   : > { %546 = vperm.xlu1 %1359, %v365_v11  }
  0x77   : > { %405 = vperm.xlu2 %1360, %v366_v20  }
  0x7c   : > { %1362 = vset.pattern.permute.xlu1 %v1444_v2  ;;  %v523_v24 = vpop.permute.xlu2 %522 }
  0x7d   : > { %469 = vperm.xlu1 %1362, %v366_v20   ;;  %vm567_vm9 = vcmp.eq.s32.totalorder %v1633_v34, %v523_v24  ;;  %v921_v24 = vld [vmem:[%s1931_s5 + $0x28] sm:$0xff] }
  0x7e   : > { %987 = vmatpush.msra.mxu2 %v921_v24  ;;  %1291 = vmatpush.msra.mxu3 %v921_v24 }
  0x7f   : > { %1363 = vset.pattern.permute.xlu2 %v1442_v0 }
  0x80   : > { %549 = vperm.xlu2 %1363, %v366_v20  }
  0x85   : > { %472 = vperm.xlu1 %1362, %v367_v12   ;;  %v446_v27 = vpop.permute.xlu2 %445 }
  0x86   : > { %vm488_vm12 = vcmp.eq.s32.totalorder %v1633_v34, %v446_v27 }
  0x88   : > { %552 = vperm.xlu2 %1363, %v367_v12   ;;  %v646_v12 = vld [vmem:[%s1610_s27 + $0x58] sm:$0xff]  ;;  %s1127_s27 = sshll.u32 %s1827_s25, 4  ;;  %s1128_s27 = int_to_ptr.vmem [resolvable:$true] %s1127_s27 }
  0x89   : > { %v520_v29 = vpop.permute.xlu1 %519  ;;  %v376_v30 = vpop.permute.xlu0 %375  ;;  %1240 = vmatmul.msk.f32.gmra.mxu0 %vm652_vm0, %v646_v12 }
  0x8a   : > { %vm422_vm1 = vcmp.eq.s32.totalorder %v1633_v34, %v376_v30  ;;  %vm566_vm3 = vcmp.eq.s32.totalorder %v1633_v34, %v520_v29  ;;  %v920_v29 = vld [vmem:[%s1931_s5 + $0x20] sm:$0xff]  ;;  %v919_v30 = vld [vmem:[%s1931_s5 + $0x18] sm:$0xff] }
  0x8b   : > { %988 = vmatpush.msra.mxu2 %v920_v29  ;;  %1292 = vmatpush.msra.mxu3 %v920_v29 }
  0x8d   : > { %1365 = vset.pattern.permute.xlu1 %v1443_v1  ;;  %v449_v32 = vpop.permute.xlu2 %448  ;;  %989 = vmatpush.msra.mxu2 %v919_v30 }
  0x8e   : > { %411 = vperm.xlu1 %1365, %v368_v15   ;;  %1293 = vmatpush.msra.mxu3 %v919_v30 }
  0x90   : > { %1366 = vset.pattern.permute.xlu2 %v1444_v2 }
  0x91   : > { %475 = vperm.xlu2 %1366, %v368_v15   ;;  %1241 = vmatmul.msk.f32.gmra.mxu0 %vm652_vm0, %v647_v21 }
  0x92   : > { %v379_v35 = vpop.permute.xlu1 %378  ;;  %v440_v36 = vpop.permute.xlu0 %439 }
  0x93   : > { %vm486_vm2 = vcmp.eq.s32.totalorder %v1633_v34, %v440_v36  ;;  %vm423_vm6 = vcmp.eq.s32.totalorder %v1633_v34, %v379_v35  ;;  %v917_v35 = vld [vmem:[%s1931_s5 + $0x8] sm:$0xff] }
  0x94   : > { %vm502_vm4 = vmor %vm422_vm1, %vm486_vm2 }
  0x95   : > { %vm582_vm7 = vmor %vm502_vm4, %vm566_vm3  ;;  %vm489_vm3 = vcmp.eq.s32.totalorder %v1633_v34, %v449_v32  ;;  %v918_v32 = vld [vmem:[%s1931_s5 + $0x10] sm:$0xff] }
  0x96   : > { %414 = vperm.xlu1 %1365, %v369_v37   ;;  %v388_v38 = vpop.permute.xlu2 %387  ;;  %v1213_v41 = vsel %vm582_vm7, 1.0, %v1445_v40  ;;  %vm503_vm10 = vmor %vm423_vm6, %vm487_vm8  ;;  %990 = vmatpush.msra.mxu2 %v918_v32 }
  0x97   : > { %1245 = vmatmul.msk.f32.vlgmr.msra.gmra.mxu1 %vm766_vm5, %v1213_v41  ;;  %vm583_vm11 = vmor %vm503_vm10, %vm567_vm9  ;;  %vm426_vm8 = vcmp.eq.s32.totalorder %v1633_v34, %v388_v38  ;;  %1294 = vmatpush.msra.mxu3 %v918_v32 }
  0x98   : > { %v1214_v46 = vsel %vm583_vm11, 1.0, %v1445_v40  ;;  %991 = vmatpush.msra.mxu2 %v917_v35 }
  0x99   : > { %478 = vperm.xlu2 %1366, %v369_v37   ;;  %1295 = vmatpush.msra.mxu3 %v917_v35 }
  0x9a   : > { %v382_v42 = vpop.permute.xlu1 %381 }
  0x9b   : > { %vm424_vm13 = vcmp.eq.s32.totalorder %v1633_v34, %v382_v42  ;;  %v526_v43 = vpop.permute.xlu0 %525 }
  0x9c   : > { %vm504_vm14 = vmor %vm424_vm13, %vm488_vm12  ;;  %vm568_vm15 = vcmp.eq.s32.totalorder %v1633_v34, %v526_v43 }
  0x9d   : > { %vm584_vm1 = vmor %vm504_vm14, %vm568_vm15 }
  0x9e   : > { %1368 = vset.pattern.permute.xlu1 %v1442_v0  ;;  %v391_v44 = vpop.permute.xlu2 %390  ;;  %v1215_v49 = vsel %vm584_vm1, 1.0, %v1445_v40 }
  0x9f   : > { %558 = vperm.xlu1 %1368, %v369_v37   ;;  %1246 = vmatmul.msk.f32.gmra.mxu1 %vm766_vm5, %v1214_v46  ;;  %vm427_vm14 = vcmp.eq.s32.totalorder %v1633_v34, %v391_v44  ;;  %v916_v37 = vld [vmem:[%s1931_s5] sm:$0xff]  ;;  %v718_v44 = vpop.f32.mrf.mxu0 }
  0xa0   : > { %992 = vmatpush.msra.mxu2 %v916_v37  ;;  %1296 = vmatpush.msra.mxu3 %v916_v37 }
  0xa1   : > { %1369 = vset.pattern.permute.xlu2 %v1443_v1 }
  0xa2   : > { %v385_v47 = vpop.permute.xlu1 %384  ;;  %417 = vperm.xlu2 %1369, %v370_v26  }
  0xa3   : > { %vm425_vm2 = vcmp.eq.s32.totalorder %v1633_v34, %v385_v47 }
  0xa4   : > { %vm505_vm4 = vmor %vm425_vm2, %vm489_vm3  ;;  %v452_v53 = vpop.permute.xlu0 %451 }
  0xa5   : > { %vm490_vm9 = vcmp.eq.s32.totalorder %v1633_v34, %v452_v53 }
  0xa6   : > { %vm506_vm10 = vmor %vm426_vm8, %vm490_vm9 }
  0xa7   : > { %561 = vperm.xlu1 %1368, %v370_v26   ;;  %1247 = vmatmul.msk.f32.gmra.mxu1 %vm766_vm5, %v1215_v49  ;;  %v535_v51 = vpop.permute.xlu2 %534  ;;  %v721_v47 = vpop.f32.mrf.mxu0 }
  0xa8   : > { %vm571_vm13 = vcmp.eq.s32.totalorder %v1633_v34, %v535_v51 }
  0xaa   : > { %420 = vperm.xlu2 %1369, %v371_v50  }
  0xab   : > { %v529_v52 = vpop.permute.xlu1 %528 }
  0xac   : > { %vm569_vm6 = vcmp.eq.s32.totalorder %v1633_v34, %v529_v52 }
  0xad   : > { %vm585_vm7 = vmor %vm505_vm4, %vm569_vm6  ;;  %v394_v62 = vpop.permute.xlu0 %393 }
  0xae   : > { %v1216_v54 = vsel %vm585_vm7, 1.0, %v1445_v40  ;;  %vm428_vm3 = vcmp.eq.s32.totalorder %v1633_v34, %v394_v62 }
  0xaf   : > { %1371 = vset.pattern.permute.xlu1 %v1444_v2  ;;  %1248 = vmatmul.msk.f32.gmra.mxu1 %vm766_vm5, %v1216_v54  ;;  %v538_v57 = vpop.permute.xlu2 %537 }
  0xb0   : > { %484 = vperm.xlu1 %1371, %v371_v50   ;;  %vm572_vm6 = vcmp.eq.s32.totalorder %v1633_v34, %v538_v57 }
  0xb2   : > { %1372 = vset.pattern.permute.xlu2 %v1442_v0 }
  0xb3   : > { %v532_v56 = vpop.permute.xlu1 %531  ;;  %564 = vperm.xlu2 %1372, %v371_v50   ;;  %v1763_v50 = vld [vmem:[%s1930_s4] ss:$0 sm:$0xff] }
  0xb4   : > { %vm570_vm11 = vcmp.eq.s32.totalorder %v1633_v34, %v532_v56 }
  0xb5   : > { %vm586_vm12 = vmor %vm506_vm10, %vm570_vm11 }
  0xb6   : > { %v1217_v58 = vsel %vm586_vm12, 1.0, %v1445_v40  ;;  %v541_v4 = vpop.permute.xlu0 %540 }
  0xb7   : > { %1249 = vmatmul.msk.f32.gmra.mxu1 %vm766_vm5, %v1217_v58  ;;  %vm573_vm10 = vcmp.eq.s32.totalorder %v1633_v34, %v541_v4  ;;  %v724_v58 = vpop.f32.mrf.mxu0 }
  0xb8   : > { %v461_v60 = vpop.permute.xlu2 %460 }
  0xb9   : > { %vm493_vm9 = vcmp.eq.s32.totalorder %v1633_v34, %v461_v60 }
  0xbc   : > { %v455_v59 = vpop.permute.xlu1 %454 }
  0xbd   : > { %vm491_vm15 = vcmp.eq.s32.totalorder %v1633_v34, %v455_v59 }
  0xbe   : > { %vm507_vm1 = vmor %vm427_vm14, %vm491_vm15 }
  0xbf   : > { %vm587_vm2 = vmor %vm507_vm1, %vm571_vm13  ;;  %v467_v16 = vpop.permute.xlu0 %466  ;;  %v727_v4 = vpop.f32.mrf.mxu0 }
  0xc0   : > { %v1218_v61 = vsel %vm587_vm2, 1.0, %v1445_v40  ;;  %v464_v1 = vpop.permute.xlu2 %463 }
  0xc1   : > { %1250 = vmatmul.msk.f32.gmra.mxu1 %vm766_vm5, %v1218_v61  ;;  %vm494_vm15 = vcmp.eq.s32.totalorder %v1633_v34, %v464_v1 }
  0xc4   : > { %v458_v0 = vpop.permute.xlu1 %457 }
  0xc5   : > { %vm492_vm4 = vcmp.eq.s32.totalorder %v1633_v34, %v458_v0 }
  0xc6   : > { %vm508_vm7 = vmor %vm428_vm3, %vm492_vm4 }
  0xc7   : > { %vm588_vm8 = vmor %vm508_vm7, %vm572_vm6  ;;  %vm495_vm6 = vcmp.eq.s32.totalorder %v1633_v34, %v467_v16  ;;  %v730_v9 = vpop.f32.mrf.mxu0 }
  0xc8   : > { %v1219_v2 = vsel %vm588_vm8, 1.0, %v1445_v40  ;;  %v409_v28 = vpop.permute.xlu0 %408 }
  0xc9   : > { %1251 = vmatmul.msk.f32.gmra.mxu1 %vm766_vm5, %v1219_v2  ;;  %v403_v8 = vpop.permute.xlu2 %402 }
  0xca   : > { %vm431_vm4 = vcmp.eq.s32.totalorder %v1633_v34, %v403_v8 }
  0xcb   : > { %vm511_vm7 = vmor %vm431_vm4, %vm495_vm6 }
  0xcd   : > { %v397_v6 = vpop.permute.xlu1 %396 }
  0xce   : > { %vm429_vm11 = vcmp.eq.s32.totalorder %v1633_v34, %v397_v6 }
  0xcf   : > { %vm509_vm12 = vmor %vm429_vm11, %vm493_vm9 }
  0xd0   : > { %vm589_vm13 = vmor %vm509_vm12, %vm573_vm10 }
  0xd1   : > { %v1220_v7 = vsel %vm589_vm13, 1.0, %v1445_v40  ;;  %v406_v13 = vpop.permute.xlu2 %405  ;;  %v556_v38 = vpop.permute.xlu0 %555 }
  0xd2   : > { %1252 = vmatmul.msk.f32.gmra.mxu1 %vm766_vm5, %v1220_v7  ;;  %vm432_vm11 = vcmp.eq.s32.totalorder %v1633_v34, %v406_v13  ;;  %vm578_vm6 = vcmp.eq.s32.totalorder %v1633_v34, %v556_v38  ;;  %v733_v13 = vpop.f32.mrf.mxu0 }
  0xd5   : > { %v400_v11 = vpop.permute.xlu1 %399 }
  0xd6   : > { %vm430_vm14 = vcmp.eq.s32.totalorder %v1633_v34, %v400_v11 }
  0xd7   : > { %vm510_vm1 = vmor %vm430_vm14, %vm494_vm15  ;;  %vm433_vm14 = vcmp.eq.s32.totalorder %v1633_v34, %v409_v28 }
  0xda   : > { %v550_v18 = vpop.permute.xlu2 %549  ;;  %v482_v48 = vpop.permute.xlu0 %481 }
  0xdb   : > { %vm576_vm10 = vcmp.eq.s32.totalorder %v1633_v34, %v550_v18 }
  0xde   : > { %v544_v15 = vpop.permute.xlu1 %543 }
  0xdf   : > { %vm574_vm2 = vcmp.eq.s32.totalorder %v1633_v34, %v544_v15 }
  0xe0   : > { %vm590_vm3 = vmor %vm510_vm1, %vm574_vm2 }
  0xe1   : > { %v1221_v17 = vsel %vm590_vm3, 1.0, %v1445_v40 }
  0xe2   : > { %1253 = vmatmul.msk.f32.gmra.mxu1 %vm766_vm5, %v1221_v17  ;;  %v553_v26 = vpop.permute.xlu2 %552 }
  0xe3   : > { %vm577_vm1 = vcmp.eq.s32.totalorder %v1633_v34, %v553_v26 }
  0xe6   : > { %v547_v19 = vpop.permute.xlu1 %546 }
  0xe7   : > { %vm575_vm8 = vcmp.eq.s32.totalorder %v1633_v34, %v547_v19  ;;  %v736_v19 = vpop.f32.mrf.mxu0 }
  0xe8   : > { %vm591_vm9 = vmor %vm511_vm7, %vm575_vm8 }
  0xe9   : > { %v1222_v20 = vsel %vm591_vm9, 1.0, %v1445_v40 }
  0xea   : > { %1254 = vmatmul.msk.f32.gmra.mxu1 %vm766_vm5, %v1222_v20 }
  0xeb   : > { %v476_v33 = vpop.permute.xlu2 %475 }
  0xec   : > { %vm498_vm4 = vcmp.eq.s32.totalorder %v1633_v34, %v476_v33 }
  0xef   : > { %v470_v25 = vpop.permute.xlu1 %469  ;;  %v739_v24 = vpop.f32.mrf.mxu0 }
  0xf0   : > { %vm496_vm12 = vcmp.eq.s32.totalorder %v1633_v34, %v470_v25 }
  0xf1   : > { %vm512_vm13 = vmor %vm432_vm11, %vm496_vm12 }
  0xf2   : > { %vm592_vm0 = vmor %vm512_vm13, %vm576_vm10 }
  0xf3   : > { %v1223_v27 = vsel %vm592_vm0, 1.0, %v1445_v40  ;;  %v479_v41 = vpop.permute.xlu2 %478 }
  0xf4   : > { %1255 = vmatmul.msk.f32.gmra.mxu1 %vm766_vm5, %v1223_v27  ;;  %vm499_vm11 = vcmp.eq.s32.totalorder %v1633_v34, %v479_v41 }
  0xf7   : > { %v473_v31 = vpop.permute.xlu1 %472  ;;  %v742_v29 = vpop.f32.mrf.mxu0 }
  0xf8   : > { %vm497_vm15 = vcmp.eq.s32.totalorder %v1633_v34, %v473_v31 }
  0xf9   : > { %vm513_vm2 = vmor %vm433_vm14, %vm497_vm15  ;;  %vm500_vm15 = vcmp.eq.s32.totalorder %v1633_v34, %v482_v48 }
  0xfa   : > { %vm593_vm3 = vmor %vm513_vm2, %vm577_vm1 }
  0xfb   : > { %v1224_v36 = vsel %vm593_vm3, 1.0, %v1445_v40  ;;  %vm928_vm3 = vcmask 523264  }
  0xfc   : > { %1256 = vmatmul.msk.f32.gmra.mxu1 %vm766_vm5, %v1224_v36  ;;  %v418_v45 = vpop.permute.xlu2 %417 }
  0xfd   : > { %vm436_vm14 = vcmp.eq.s32.totalorder %v1633_v34, %v418_v45 }
  0xfe   : > { %vm516_vm1 = vmor %vm436_vm14, %vm500_vm15 }
  0xff   : > { %v745_v35 = vpop.f32.mrf.mxu0 }
 0x100   : > { %v412_v39 = vpop.permute.xlu1 %411 }
 0x101   : > { %vm434_vm7 = vcmp.eq.s32.totalorder %v1633_v34, %v412_v39  ;;  %v757_v39 = vpop.f32.mrf.mxu3 }
 0x102   : > { %vm514_vm8 = vmor %vm434_vm7, %vm498_vm4 }
 0x103   : > { %vm594_vm9 = vmor %vm514_vm8, %vm578_vm6 }
 0x104   : > { %v1225_v42 = vsel %vm594_vm9, 1.0, %v1445_v40  ;;  %v421_v52 = vpop.permute.xlu2 %420 }
 0x105   : > { %1257 = vmatmul.msk.f32.vlgmr.msrb.gmra.mxu3 %vm766_vm5, %v1225_v42  ;;  %vm437_vm7 = vcmp.eq.s32.totalorder %v1633_v34, %v421_v52 }
 0x107   : > { %v748_v42 = vpop.f32.mrf.mxu0 }
 0x108   : > { %v415_v43 = vpop.permute.xlu1 %414 }
 0x109   : > { %vm435_vm10 = vcmp.eq.s32.totalorder %v1633_v34, %v415_v43 }
 0x10a   : > { %vm515_vm12 = vmor %vm435_vm10, %vm499_vm11 }
 0x10d   : > { %v565_v61 = vpop.permute.xlu2 %564 }
 0x10e   : > { %vm581_vm6 = vcmp.eq.s32.totalorder %v1633_v34, %v565_v61 }
 0x10f   : > { %v751_v48 = vpop.f32.mrf.mxu0 }
 0x111   : > { %v559_v46 = vpop.permute.xlu1 %558 }
 0x112   : > { %vm579_vm13 = vcmp.eq.s32.totalorder %v1633_v34, %v559_v46  ;;  %v760_v46 = vpop.f32.mrf.mxu3 }
 0x113   : > { %vm595_vm0 = vmor %vm515_vm12, %vm579_vm13 }
 0x114   : > { %v1226_v49 = vsel %vm595_vm0, 1.0, %v1445_v40  ;;  %v832_v51 = vpop.f32.mrf.mxu1 }
 0x115   : > { %1258 = vmatmul.msk.f32.gmra.mxu3 %vm766_vm5, %v1226_v49  ;;  %v833_v53 = vadd.f32 %v832_v51, %v718_v44 }
 0x117   : > { %v884_v54 = vadd.f32 %v1763_v50, %v833_v53 }
 0x119   : > { %v562_v55 = vpop.permute.xlu1 %561  ;;  %v900_v56 = vmax.f32 %v884_v54, 0.0 }
 0x11a   : > { %vm580_vm2 = vcmp.eq.s32.totalorder %v1633_v34, %v562_v55  ;;  %v763_v54 = vpop.f32.mrf.mxu3  ;;  %v754_v55 = vpop.f32.mrf.mxu0 }
 0x11b   : > { %vm596_vm4 = vmor %vm516_vm1, %vm580_vm2  ;;  %1261 = vmatmul.msk.f32.vlgmr.msra.gmra.mxu2 %vm928_vm3, %v900_v56 }
 0x11c   : > { %v1227_v57 = vsel %vm596_vm4, 1.0, %v1445_v40  ;;  %v835_v59 = vpop.f32.mrf.mxu1 }
 0x11d   : > { %1259 = vmatmul.msk.f32.gmra.mxu3 %vm766_vm5, %v1227_v57  ;;  %v836_v60 = vadd.f32 %v835_v59, %v721_v47 }
 0x11f   : > { %v885_v62 = vadd.f32 %v1763_v50, %v836_v60 }
 0x121   : > { %v901_v0 = vmax.f32 %v885_v62, 0.0 }
 0x122   : > { %v485_v63 = vpop.permute.xlu1 %484 }
 0x123   : > { %vm501_vm8 = vcmp.eq.s32.totalorder %v1633_v34, %v485_v63  ;;  %1262 = vmatmul.msk.f32.gmra.mxu2 %vm928_vm3, %v901_v0  ;;  %v1806_v0 = vld [vmem:[%s1932_s6] ss:$0 sm:$0xff] }
 0x124   : > { %vm517_vm9 = vmor %vm437_vm7, %vm501_vm8  ;;  %v838_v1 = vpop.f32.mrf.mxu1 }
 0x125   : > { %vm597_vm10 = vmor %vm517_vm9, %vm581_vm6  ;;  %v839_v3 = vadd.f32 %v838_v1, %v724_v58 }
 0x126   : > { %v1228_v2 = vsel %vm597_vm10, 1.0, %v1445_v40 }
 0x127   : > { %1260 = vmatmul.msk.f32.gmra.mxu3 %vm766_vm5, %v1228_v2  ;;  %v886_v5 = vadd.f32 %v1763_v50, %v839_v3 }
 0x129   : > { %v902_v6 = vmax.f32 %v886_v5, 0.0 }
 0x12b   : > { %1263 = vmatmul.msk.f32.gmra.mxu2 %vm928_vm3, %v902_v6 }
 0x12c   : > { %v841_v7 = vpop.f32.mrf.mxu1 }
 0x12d   : > { %v842_v8 = vadd.f32 %v841_v7, %v727_v4  ;;  %v1814_v4 = vld [vmem:[%s1933_s7] ss:$0 sm:$0xff] }
 0x12e   : > { %v1821_v7 = vld [vmem:[%s1934_s8] ss:$0 sm:$0xff] }
 0x12f   : > { %v887_v34 = vadd.f32 %v1763_v50, %v842_v8 }
 0x131   : > { %v903_v10 = vmax.f32 %v887_v34, 0.0 }
 0x133   : > { %1264 = vmatmul.msk.f32.gmra.mxu2 %vm928_vm3, %v903_v10 }
 0x134   : > { %v844_v11 = vpop.f32.mrf.mxu1 }
 0x135   : > { %v845_v12 = vadd.f32 %v844_v11, %v730_v9 }
 0x137   : > { %v888_v40 = vadd.f32 %v1763_v50, %v845_v12 }
 0x139   : > { %v904_v14 = vmax.f32 %v888_v40, 0.0 }
 0x13b   : > { %1265 = vmatmul.msk.f32.gmra.mxu2 %vm928_vm3, %v904_v14 }
 0x13e   : > { %v847_v15 = vpop.f32.mrf.mxu1 }
 0x13f   : > { %v848_v16 = vadd.f32 %v847_v15, %v733_v13 }
 0x141   : > { %v889_v17 = vadd.f32 %v1763_v50, %v848_v16 }
 0x143   : > { %v905_v18 = vmax.f32 %v889_v17, 0.0 }
 0x145   : > { %1266 = vmatmul.msk.f32.gmra.mxu2 %vm928_vm3, %v905_v18 }
 0x146   : > { %v850_v20 = vpop.f32.mrf.mxu1 }
 0x147   : > { %v851_v21 = vadd.f32 %v850_v20, %v736_v19 }
 0x149   : > { %v890_v22 = vadd.f32 %v1763_v50, %v851_v21 }
 0x14b   : > { %v906_v23 = vmax.f32 %v890_v22, 0.0 }
 0x14d   : > { %1267 = vmatmul.msk.f32.gmra.mxu2 %vm928_vm3, %v906_v23 }
 0x14f   : > { %v853_v25 = vpop.f32.mrf.mxu1 }
 0x150   : > { %v854_v26 = vadd.f32 %v853_v25, %v739_v24 }
 0x152   : > { %v891_v27 = vadd.f32 %v1763_v50, %v854_v26 }
 0x154   : > { %v907_v28 = vmax.f32 %v891_v27, 0.0 }
 0x156   : > { %1268 = vmatmul.msk.f32.gmra.mxu2 %vm928_vm3, %v907_v28 }
 0x15f   : > { %v856_v30 = vpop.f32.mrf.mxu1 }
 0x160   : > { %v857_v31 = vadd.f32 %v856_v30, %v742_v29 }
 0x162   : > { %v892_v32 = vadd.f32 %v1763_v50, %v857_v31 }
 0x164   : > { %v908_v33 = vmax.f32 %v892_v32, 0.0 }
 0x166   : > { %1269 = vmatmul.msk.f32.gmra.mxu2 %vm928_vm3, %v908_v33 }
 0x167   : > { %v859_v36 = vpop.f32.mrf.mxu1 }
 0x168   : > { %v860_v37 = vadd.f32 %v859_v36, %v745_v35 }
 0x16a   : > { %v893_v38 = vadd.f32 %v1763_v50, %v860_v37 }
 0x16c   : > { %v909_v41 = vmax.f32 %v893_v38, 0.0 }
 0x16e   : > { %1270 = vmatmul.msk.f32.gmra.mxu2 %vm928_vm3, %v909_v41 }
 0x171   : > { %v862_v43 = vpop.f32.mrf.mxu1 }
 0x172   : > { %v863_v44 = vadd.f32 %v862_v43, %v748_v42 }
 0x174   : > { %v894_v45 = vadd.f32 %v1763_v50, %v863_v44 }
 0x176   : > { %v910_v47 = vmax.f32 %v894_v45, 0.0 }
 0x178   : > { %1271 = vmatmul.msk.f32.gmra.mxu2 %vm928_vm3, %v910_v47 }
 0x179   : > { %v865_v49 = vpop.f32.mrf.mxu1 }
 0x17a   : > { %v866_v51 = vadd.f32 %v865_v49, %v751_v48 }
 0x17c   : > { %v895_v52 = vadd.f32 %v1763_v50, %v866_v51 }
 0x17e   : > { %v911_v53 = vmax.f32 %v895_v52, 0.0 }
 0x180   : > { %1272 = vmatmul.msk.f32.vlgmr.msra.gmra.mxu3 %vm928_vm3, %v911_v53 }
 0x188   : > { %v868_v56 = vpop.f32.mrf.mxu3 }
 0x189   : > { %v869_v57 = vadd.f32 %v868_v56, %v754_v55 }
 0x18b   : > { %v896_v58 = vadd.f32 %v1763_v50, %v869_v57 }
 0x18d   : > { %v912_v59 = vmax.f32 %v896_v58, 0.0 }
 0x18f   : > { %1273 = vmatmul.msk.f32.gmra.mxu3 %vm928_vm3, %v912_v59 }
 0x198   : > { %v871_v60 = vpop.f32.mrf.mxu3 }
 0x199   : > { %v872_v61 = vadd.f32 %v871_v60, %v757_v39 }
 0x19b   : > { %v897_v62 = vadd.f32 %v1763_v50, %v872_v61 }
 0x19d   : > { %v913_v63 = vmax.f32 %v897_v62, 0.0 }
 0x19e   : > { %v994_v1 = vpop.f32.mrf.mxu2 }
 0x19f   : > { %1274 = vmatmul.msk.f32.gmra.mxu3 %vm928_vm3, %v913_v63  ;;  %v995_v3 = vadd.f32 %v1806_v0, %v994_v1 }
 0x1a0   : > { %v874_v2 = vpop.f32.mrf.mxu3 }
 0x1a1   : > { %v875_v5 = vadd.f32 %v874_v2, %v760_v46  ;;  %v1042_v6 = vmax.f32 %v995_v3, 0.0 }
 0x1a3   : > { %v898_v8 = vadd.f32 %v1763_v50, %v875_v5  ;;  %v1062_v34 = vmul.f32 %v1814_v4, %v1042_v6 }
 0x1a5   : > { %v914_v9 = vmax.f32 %v898_v8, 0.0  ;;  %v1082_v10 = vadd.f32 %v1821_v7, %v1062_v34 }
 0x1a6   : > { %v997_v11 = vpop.f32.mrf.mxu2 }
 0x1a7   : > { %1275 = vmatmul.msk.f32.gmra.mxu3 %vm928_vm3, %v914_v9  ;;  %1098 = vst [vmem:[%s1827_s25] sm:$0xff] %v1082_v10  ;;  %v998_v12 = vadd.f32 %v1806_v0, %v997_v11 }
 0x1a9   : > { %v1043_v13 = vmax.f32 %v998_v12, 0.0 }
 0x1aa   : > { %v877_v40 = vpop.f32.mrf.mxu3 }
 0x1ab   : > { %v878_v14 = vadd.f32 %v877_v40, %v763_v54  ;;  %v1063_v15 = vmul.f32 %v1814_v4, %v1043_v13 }
 0x1ad   : > { %v899_v16 = vadd.f32 %v1763_v50, %v878_v14  ;;  %v1083_v17 = vadd.f32 %v1821_v7, %v1063_v15 }
 0x1ae   : > { %v1000_v19 = vpop.f32.mrf.mxu2 }
 0x1af   : > { %v915_v18 = vmax.f32 %v899_v16, 0.0  ;;  %1099 = vst [vmem:[%s1827_s25 + $0x8] sm:$0xff] %v1083_v17  ;;  %v1001_v20 = vadd.f32 %v1806_v0, %v1000_v19 }
 0x1b1   : > { %1276 = vmatmul.msk.f32.gmra.mxu3 %vm928_vm3, %v915_v18  ;;  %v1044_v21 = vmax.f32 %v1001_v20, 0.0 }
 0x1b3   : > { %v1064_v22 = vmul.f32 %v1814_v4, %v1044_v21 }
 0x1b5   : > { %v1084_v23 = vadd.f32 %v1821_v7, %v1064_v22 }
 0x1b6   : > { %v1003_v24 = vpop.f32.mrf.mxu2 }
 0x1b7   : > { %1100 = vst [vmem:[%s1827_s25 + $0x10] sm:$0xff] %v1084_v23  ;;  %v1004_v50 = vadd.f32 %v1806_v0, %v1003_v24 }
 0x1b9   : > { %v1045_v25 = vmax.f32 %v1004_v50, 0.0 }
 0x1bb   : > { %v1065_v26 = vmul.f32 %v1814_v4, %v1045_v25 }
 0x1bd   : > { %v1085_v27 = vadd.f32 %v1821_v7, %v1065_v26 }
 0x1be   : > { %v1006_v28 = vpop.f32.mrf.mxu2 }
 0x1bf   : > { %1101 = vst [vmem:[%s1827_s25 + $0x18] sm:$0xff] %v1085_v27  ;;  %v1007_v29 = vadd.f32 %v1806_v0, %v1006_v28 }
 0x1c1   : > { %v1046_v30 = vmax.f32 %v1007_v29, 0.0 }
 0x1c3   : > { %v1066_v31 = vmul.f32 %v1814_v4, %v1046_v30 }
 0x1c5   : > { %v1086_v32 = vadd.f32 %v1821_v7, %v1066_v31 }
 0x1c7   : > { %1102 = vst [vmem:[%s1827_s25 + $0x20] sm:$0xff] %v1086_v32 }
 0x1c8   : > { %v1009_v33 = vpop.f32.mrf.mxu2 }
 0x1c9   : > { %v1010_v35 = vadd.f32 %v1806_v0, %v1009_v33 }
 0x1cb   : > { %v1047_v36 = vmax.f32 %v1010_v35, 0.0 }
 0x1cd   : > { %v1067_v37 = vmul.f32 %v1814_v4, %v1047_v36 }
 0x1cf   : > { %v1087_v38 = vadd.f32 %v1821_v7, %v1067_v37 }
 0x1d0   : > { %v1012_v39 = vpop.f32.mrf.mxu2 }
 0x1d1   : > { %1103 = vst [vmem:[%s1827_s25 + $0x28] sm:$0xff] %v1087_v38  ;;  %v1013_v41 = vadd.f32 %v1806_v0, %v1012_v39 }
 0x1d3   : > { %v1048_v42 = vmax.f32 %v1013_v41, 0.0 }
 0x1d5   : > { %v1068_v43 = vmul.f32 %v1814_v4, %v1048_v42 }
 0x1d7   : > { %v1088_v44 = vadd.f32 %v1821_v7, %v1068_v43 }
 0x1d9   : > { %1104 = vst [vmem:[%s1827_s25 + $0x30] sm:$0xff] %v1088_v44  ;;  %v1015_v45 = vpop.f32.mrf.mxu2 }
 0x1da   : > { %v1016_v46 = vadd.f32 %v1806_v0, %v1015_v45 }
 0x1dc   : > { %v1049_v47 = vmax.f32 %v1016_v46, 0.0 }
 0x1de   : > { %v1069_v48 = vmul.f32 %v1814_v4, %v1049_v47 }
 0x1e0   : > { %v1089_v49 = vadd.f32 %v1821_v7, %v1069_v48 }
 0x1e2   : > { %1105 = vst [vmem:[%s1827_s25 + $0x38] sm:$0xff] %v1089_v49 }
 0x1e9   : > { %v1018_v51 = vpop.f32.mrf.mxu2 }
 0x1ea   : > { %v1019_v52 = vadd.f32 %v1806_v0, %v1018_v51 }
 0x1ec   : > { %v1050_v53 = vmax.f32 %v1019_v52, 0.0 }
 0x1ee   : > { %v1070_v54 = vmul.f32 %v1814_v4, %v1050_v53 }
 0x1f0   : > { %v1090_v55 = vadd.f32 %v1821_v7, %v1070_v54 }
 0x1f1   : > { %v1021_v56 = vpop.f32.mrf.mxu2 }
 0x1f2   : > { %1106 = vst [vmem:[%s1827_s25 + $0x40] sm:$0xff] %v1090_v55  ;;  %v1022_v57 = vadd.f32 %v1806_v0, %v1021_v56 }
 0x1f4   : > { %v1051_v58 = vmax.f32 %v1022_v57, 0.0 }
 0x1f6   : > { %v1071_v59 = vmul.f32 %v1814_v4, %v1051_v58 }
 0x1f8   : > { %v1091_v60 = vadd.f32 %v1821_v7, %v1071_v59 }
 0x1fa   : > { %1107 = vst [vmem:[%s1827_s25 + $0x48] sm:$0xff] %v1091_v60 }
 0x1fb   : > { %v1024_v61 = vpop.f32.mrf.mxu2 }
 0x1fc   : > { %v1025_v62 = vadd.f32 %v1806_v0, %v1024_v61 }
 0x1fe   : > { %v1052_v63 = vmax.f32 %v1025_v62, 0.0 }
 0x200   : > { %v1072_v1 = vmul.f32 %v1814_v4, %v1052_v63 }
 0x202   : > { %v1092_v2 = vadd.f32 %v1821_v7, %v1072_v1 }
 0x203   : > { %v1027_v3 = vpop.f32.mrf.mxu3 }
 0x204   : > { %1108 = vst [vmem:[%s1827_s25 + $0x50] sm:$0xff] %v1092_v2  ;;  %v1028_v5 = vadd.f32 %v1806_v0, %v1027_v3 }
 0x206   : > { %v1053_v6 = vmax.f32 %v1028_v5, 0.0 }
 0x208   : > { %v1073_v8 = vmul.f32 %v1814_v4, %v1053_v6 }
 0x20a   : > { %v1093_v34 = vadd.f32 %v1821_v7, %v1073_v8 }
 0x20c   : > { %1109 = vst [vmem:[%s1827_s25 + $0x58] sm:$0xff] %v1093_v34 }
 0x212   : > { %v1030_v9 = vpop.f32.mrf.mxu3 }
 0x213   : > { %v1031_v10 = vadd.f32 %v1806_v0, %v1030_v9 }
 0x215   : > { %v1054_v11 = vmax.f32 %v1031_v10, 0.0 }
 0x217   : > { %v1074_v12 = vmul.f32 %v1814_v4, %v1054_v11 }
 0x219   : > { %v1094_v40 = vadd.f32 %v1821_v7, %v1074_v12 }
 0x21b   : > { %1110 = vst [vmem:[%s1827_s25 + $0x60] sm:$0xff] %v1094_v40 }
 0x222   : > { %v1033_v13 = vpop.f32.mrf.mxu3 }
 0x223   : > { %v1034_v14 = vadd.f32 %v1806_v0, %v1033_v13 }
 0x225   : > { %v1055_v15 = vmax.f32 %v1034_v14, 0.0 }
 0x227   : > { %v1075_v16 = vmul.f32 %v1814_v4, %v1055_v15 }
 0x229   : > { %v1095_v17 = vadd.f32 %v1821_v7, %v1075_v16 }
 0x22a   : > { %v1036_v18 = vpop.f32.mrf.mxu3 }
 0x22b   : > { %1111 = vst [vmem:[%s1827_s25 + $0x68] sm:$0xff] %v1095_v17  ;;  %v1037_v19 = vadd.f32 %v1806_v0, %v1036_v18 }
 0x22d   : > { %v1056_v20 = vmax.f32 %v1037_v19, 0.0 }
 0x22f   : > { %v1076_v21 = vmul.f32 %v1814_v4, %v1056_v20 }
 0x231   : > { %v1096_v22 = vadd.f32 %v1821_v7, %v1076_v21 }
 0x233   : > { %1112 = vst [vmem:[%s1827_s25 + $0x70] sm:$0xff] %v1096_v22 }
 0x234   : > { %v1039_v23 = vpop.f32.mrf.mxu3 }
 0x235   : > { %v1040_v24 = vadd.f32 %v1806_v0, %v1039_v23 }
 0x237   : > { %v1057_v50 = vmax.f32 %v1040_v24, 0.0 }
 0x239   : > { %v1077_v25 = vmul.f32 %v1814_v4, %v1057_v50 }
 0x23b   : > { %v1097_v26 = vadd.f32 %v1821_v7, %v1077_v25 }
 0x23d   : > { %1113 = vst [vmem:[%s1827_s25 + $0x78] sm:$0xff] %v1097_v26 }
 0x23e   : > { %1405 = shalt.err (!%p1402_p3)
}
 0x23f   : > { %s1446_s28 = smov 128   ;;  %s1447_s25 = smov 8  }
 0x240   : > { %1297 = dma.vmem_to_hbm [thread:$0]  (%p1536_p5), %s1128_s27, 2048, %s1130_s29, %s1115_s13, %s1446_s28, %s1446_s28, %s1447_s25  }
 0x241 PF: > { %p1303_p4 = scmp.ge.s32.totalorder %s1440_s12, 2  ;;  %s1144_s26 = sand.u32 1, %s1428_s30  }
 0x242   : > { %s1145_s21 = scalar_lea.sflag [#allocation3], %s1144_s26 }
 0x243   : > { %p1300_p7 = pnand %p1303_p4, %p1540_p6 }
 0x245   : > { %p1301_p8 = pneg %p1300_p7 }
 0x247   : > { %1423 = dma.done.wait (%p1301_p8), %s1145_s21, 2048  }
 0x248   : > { %1425 = vsyncadd (%p1301_p8), %s1145_s21, 4294965248  ;;  %p19_p9 = scmp.ge.s32.totalorder %s1523_s15, 4   ;;  %s1938_s30 = smov %s1432_s10 }
 0x249   : > { %s1939_s10 = smov %s1436_s11  ;;  %s1940_s11 = smov %s1534_s18 }
 0x24a   : > { %s1941_s12 = smov %s1523_s15  ;;  %21 = sbr.rel (!%p19_p9) target bundleno = 3 (0x3), region = 94 }
 0x24f   :  { %1151 = vsyncpa [#allocation3], 1 }
 0x250   :  { %1153 = vsyncpa [#allocation3 + $0x1], 1 }

</bundles_post_ra>
